<compile_context>
chip_gen: v5e
topology: v5e:2x2
jax: 0.10.0
libtpu: 0.0.40
codegen_flags: <defaults>
</compile_context>

<pallas_src>
import jax
import jax.numpy as jnp
from jax.experimental import pallas as pl
from jax.experimental.pallas import tpu as pltpu

LANE = 128        # lane width: hidden/output feature dims are padded to this
HALF = LANE // 2  # logvar lanes start here in the packed bottleneck output
SUBLANE = 8       # sublane granularity for the batch dim


def _round_up(n, m):
    return ((n + m - 1) // m) * m


# ----------------------------- fused kernel -------------------------------- #

def _make_vae_kernel(n_enc_hidden: int, n_dec_hidden: int, latent_dim: int):
    """Fused VAE forward kernel for a fixed layer count.

    Ref order (all VMEM):
      inputs : x,
               [W, b] * n_enc_hidden,
               W_bn, b_bn          (packed mu/logvar bottleneck),
               eps,
               [W, b] * n_dec_hidden,
               W_out, b_out
      outputs: recon, mulogvar     (mu in lanes [0:latent), logvar in [64:64+latent))
      scratch: eps_pad (tile_b, 128) f32
    """

    def kernel(*refs):
        it = iter(refs)

        def linear(h, w_ref, b_ref, relu):
            # bf16 MXU inputs, f32 accumulation; bias added in f32.
            y = jnp.dot(h.astype(jnp.bfloat16), w_ref[...],
                        preferred_element_type=jnp.float32)
            y = y + b_ref[...]                      # [1, P] broadcasts over batch
            if relu:
                y = jnp.maximum(y, 0.0)
            return y

        x_ref = next(it)
        enc = [(next(it), next(it)) for _ in range(n_enc_hidden)]
        w_bn, b_bn = next(it), next(it)
        eps_ref = next(it)
        dec = [(next(it), next(it)) for _ in range(n_dec_hidden)]
        w_out, b_out = next(it), next(it)
        recon_ref, mulv_ref = next(it), next(it)
        eps_pad_ref = next(it)

        # ---------------- encoder ----------------
        h = x_ref[...].astype(jnp.float32)          # [tile_b, din] (unpadded lanes)
        for w_ref, b_ref in enc:
            h = linear(h, w_ref, b_ref, relu=True)

        # packed bottleneck: one matmul; mu -> lanes [0:latent),
        # logvar -> lanes [HALF:HALF+latent), all other lanes exactly 0.
        y = linear(h, w_bn, b_bn, relu=False)

        # ---------------- reparameterize ----------------
        # Rotate by HALF lanes so logvar sits in lanes [0:latent).
        logvar_full = pltpu.roll(y, HALF, 1)        # XLU slot
        # Place the (unpadded) eps tile into the first `latent` lanes.
        eps_pad_ref[...] = jnp.zeros_like(eps_pad_ref)
        eps_pad_ref[:, :latent_dim] = eps_ref[...].astype(jnp.float32)
        eps_full = eps_pad_ref[...]
        # z lanes [0:latent) = mu + eps*exp(0.5*logvar); lanes [HALF:HALF+latent)
        # carry logvar garbage which the zero rows of the first decoder weight
        # annihilate; every other lane is 0.
        z = y + eps_full * jnp.exp(0.5 * logvar_full)   # exp -> EUP

        # ---------------- decoder ----------------
        h = z
        for w_ref, b_ref in dec:
            h = linear(h, w_ref, b_ref, relu=True)
        recon = linear(h, w_out, b_out, relu=False)

        # ---------------- outputs (lane-dense, unmasked stores) -------------
        recon_ref[...] = recon.astype(recon_ref.dtype)
        mulv_ref[...] = y.astype(mulv_ref.dtype)

    return kernel


def _fused_vae_call(params, x_p, eps_p, tile_b):
    """One pallas_call for the whole VAE forward."""
    Bp, din = x_p.shape
    latent = eps_p.shape[1]
    P = LANE
    assert Bp % tile_b == 0
    grid = (Bp // tile_b,)

    def const_spec(arr):
        # Weights/biases never change across grid steps.
        return pl.BlockSpec(tuple(arr.shape), lambda i: (0, 0))

    x_spec = pl.BlockSpec((tile_b, din), lambda i: (i, 0))
    eps_spec = pl.BlockSpec((tile_b, latent), lambda i: (i, 0))
    out_spec = pl.BlockSpec((tile_b, P), lambda i: (i, 0))

    inputs = [x_p]
    in_specs = [x_spec]
    for w, b in params["enc_hidden"]:
        inputs += [w, b]
        in_specs += [const_spec(w), const_spec(b)]
    inputs += [params["w_bn"], params["b_bn"]]
    in_specs += [const_spec(params["w_bn"]), const_spec(params["b_bn"])]
    inputs.append(eps_p)
    in_specs.append(eps_spec)
    for w, b in params["dec_hidden"]:
        inputs += [w, b]
        in_specs += [const_spec(w), const_spec(b)]
    inputs += [params["w_out"], params["b_out"]]
    in_specs += [const_spec(params["w_out"]), const_spec(params["b_out"])]

    out_shape = (jax.ShapeDtypeStruct((Bp, P), jnp.float32),   # recon (padded)
                 jax.ShapeDtypeStruct((Bp, P), jnp.float32))   # packed mu/logvar
    out_specs = (out_spec, out_spec)

    # Advisory cost estimate so XLA schedules the fused call sensibly.
    weights = ([w for (w, _) in params["enc_hidden"]] + [params["w_bn"]]
               + [w for (w, _) in params["dec_hidden"]] + [params["w_out"]])
    macs = sum(int(w.shape[0]) * int(w.shape[1]) for w in weights)
    bytes_in = sum(int(a.size) * a.dtype.itemsize for a in inputs)
    bytes_out = sum(int(s.size) * 4 for s in out_shape)
    cost = pl.CostEstimate(flops=2 * Bp * macs,
                           transcendentals=Bp * P,
                           bytes_accessed=bytes_in + bytes_out)

    kernel = _make_vae_kernel(len(params["enc_hidden"]),
                              len(params["dec_hidden"]), latent)
    return pl.pallas_call(
        kernel,
        out_shape=out_shape,
        grid=grid,
        in_specs=in_specs,
        out_specs=out_specs,
        scratch_shapes=[pltpu.VMEM((tile_b, P), jnp.float32)],   # eps lane-pad
        compiler_params=pltpu.CompilerParams(
            dimension_semantics=("parallel",),   # batch tiles -> both TCs on v7x
        ),
        cost_estimate=cost,
    )(*inputs)


# ------------------------------ parameters ---------------------------------- #

def init_vae_params(key, input_dim, hidden_layer_dims, latent_dim):
    """Raw (unpadded) params, PyTorch-style uniform(-1/sqrt(fan_in), ..) init.
    Weights stored [in, out] (transpose of PyTorch)."""
    def init_linear(key, din, dout):
        kw, kb = jax.random.split(key)
        bound = float(din) ** -0.5
        w = jax.random.uniform(kw, (din, dout), jnp.float32, -bound, bound)
        b = jax.random.uniform(kb, (dout,), jnp.float32, -bound, bound)
        return w, b

    params = {"encoder": [], "decoder": []}
    prev = input_dim
    for d in list(hidden_layer_dims) + [latent_dim * 2]:
        key, sub = jax.random.split(key)
        params["encoder"].append(init_linear(sub, prev, d))
        prev = d
    prev = latent_dim
    for d in list(reversed(hidden_layer_dims)) + [input_dim]:
        key, sub = jax.random.split(key)
        params["decoder"].append(init_linear(sub, prev, d))
        prev = d
    return params


def pad_params(raw, latent_dim, input_dim):
    """Pad weights/biases to lane-dense blocks once at init.

    * Weights are cast to bf16 (MXU inputs); biases stay f32.
    * The first layer keeps its raw input width (x is not lane-padded); every
      later layer has its input width padded to 128.
    * The bottleneck is packed: mu columns -> lanes [0:latent),
      logvar columns -> lanes [HALF:HALF+latent).
    """
    # TODO(synk): if a hidden dim ever exceeds 128, tile the weights over K/N
    # instead of padding to a single 128-lane block.
    P = LANE
    assert latent_dim <= HALF, "latent_dim must fit in half a lane tile"

    def pad_wb(w, b, in_pad):
        din, dout = w.shape
        assert din <= in_pad and dout <= P, "feature dims must fit one 128-lane block"
        wp = jnp.zeros((in_pad, P), jnp.float32).at[:din, :dout].set(w)
        bp = jnp.zeros((1, P), jnp.float32).at[0, :dout].set(b)
        return wp.astype(jnp.bfloat16), bp

    enc, dec = raw["encoder"], raw["decoder"]
    padded = {"enc_hidden": []}

    cur_in = input_dim                       # x arrives unpadded
    for (w, b) in enc[:-1]:
        padded["enc_hidden"].append(pad_wb(w, b, cur_in))
        cur_in = P                           # hidden activations are lane-padded

    # packed bottleneck
    w_bn, b_bn = enc[-1]
    din_bn = w_bn.shape[0]
    assert din_bn <= cur_in
    wp = jnp.zeros((cur_in, P), jnp.float32)
    wp = wp.at[:din_bn, :latent_dim].set(w_bn[:, :latent_dim])
    wp = wp.at[:din_bn, HALF:HALF + latent_dim].set(w_bn[:, latent_dim:])
    bp = jnp.zeros((1, P), jnp.float32)
    bp = bp.at[0, :latent_dim].set(b_bn[:latent_dim])
    bp = bp.at[0, HALF:HALF + latent_dim].set(b_bn[latent_dim:])
    padded["w_bn"], padded["b_bn"] = wp.astype(jnp.bfloat16), bp

    padded["dec_hidden"] = [pad_wb(w, b, P) for (w, b) in dec[:-1]]
    w_last, b_last = dec[-1]
    padded["w_out"], padded["b_out"] = pad_wb(w_last, b_last, P)
    return padded


# ------------------------------ forward pass --------------------------------- #

@jax.jit
def vae_forward(params, x, eps):
    """Returns (recon, mu, logvar). `eps` ~ N(0,1) of shape [B, latent_dim]."""
    B, din = x.shape
    latent = eps.shape[1]

    Bp = _round_up(max(B, SUBLANE), SUBLANE)
    if Bp <= 256:
        tile_b = Bp                                   # one step; latency-bound anyway
    else:
        # >= 2 grid steps (both TensorCores on v7x), tiles capped at 512 rows.
        tile_b = min(_round_up((Bp + 1) // 2, SUBLANE), 512)
        Bp = _round_up(Bp, tile_b)

    # Only the batch dim is padded; feature dims stay at their raw widths.
    x_p = jnp.zeros((Bp, din), jnp.float32).at[:B].set(x.astype(jnp.float32))
    eps_p = jnp.zeros((Bp, latent), jnp.float32).at[:B].set(eps.astype(jnp.float32))

    recon_p, mulv_p = _fused_vae_call(params, x_p, eps_p, tile_b)

    return (recon_p[:B, :din],
            mulv_p[:B, :latent],
            mulv_p[:B, HALF:HALF + latent])


# ----------------------------- plain-JAX reference --------------------------- #

def vae_reference(raw, x, eps, latent_dim):
    def run(layers, h):
        for i, (w, b) in enumerate(layers):
            h = h @ w + b
            if i < len(layers) - 1:
                h = jnp.maximum(h, 0.0)
        return h

    bottleneck = run(raw["encoder"], x)
    mu, logvar = bottleneck[:, :latent_dim], bottleneck[:, latent_dim:]
    z = mu + eps * jnp.exp(0.5 * logvar)
    recon = run(raw["decoder"], z)
    return recon, mu, logvar


# --------------------------------- main -------------------------------------- #

if __name__ == "__main__":
    input_dim = 16
    hidden_layer_dims = [32, 16]
    latent_dim = 8

    root = jax.random.PRNGKey(0)
    k_params, k_x, k_eps, k_x2, k_eps2 = jax.random.split(root, 5)

    raw_params = init_vae_params(k_params, input_dim, hidden_layer_dims, latent_dim)
    padded_params = pad_params(raw_params, latent_dim, input_dim)

    def check(batch, kx, keps):
        x = jax.random.normal(kx, (batch, input_dim), jnp.float32)
        eps = jax.random.normal(keps, (batch, latent_dim), jnp.float32)
        recon, mu, logvar = vae_forward(padded_params, x, eps)
        jax.block_until_ready((recon, mu, logvar))

        assert recon.shape == (batch, input_dim)
        assert mu.shape == (batch, latent_dim)
        assert logvar.shape == (batch, latent_dim)

        r_recon, r_mu, r_logvar = vae_reference(raw_params, x, eps, latent_dim)
        assert bool(jnp.all(jnp.isfinite(recon)))
        assert bool(jnp.allclose(mu, r_mu, atol=5e-2, rtol=5e-2))
        assert bool(jnp.allclose(logvar, r_logvar, atol=5e-2, rtol=5e-2))
        assert bool(jnp.allclose(recon, r_recon, atol=5e-2, rtol=5e-2))

    # small batch: single grid step
    check(8, k_x, k_eps)
    # larger (non-aligned) batch: exercises batch padding and a 2-step parallel grid
    check(300, k_x2, k_eps2)

    print("KERNEL_OK")
</pallas_src>

<mosaic_0001>
module attributes {stable_mosaic.version = 11 : i64} {
  func.func @kernel(%arg0: i32, %arg1: memref<8x16xf32, #tpu.memory_space<vmem>>, %arg2: memref<16x128xbf16, #tpu.memory_space<vmem>>, %arg3: memref<1x128xf32, #tpu.memory_space<vmem>>, %arg4: memref<128x128xbf16, #tpu.memory_space<vmem>>, %arg5: memref<1x128xf32, #tpu.memory_space<vmem>>, %arg6: memref<128x128xbf16, #tpu.memory_space<vmem>>, %arg7: memref<1x128xf32, #tpu.memory_space<vmem>>, %arg8: memref<8x8xf32, #tpu.memory_space<vmem>>, %arg9: memref<128x128xbf16, #tpu.memory_space<vmem>>, %arg10: memref<1x128xf32, #tpu.memory_space<vmem>>, %arg11: memref<128x128xbf16, #tpu.memory_space<vmem>>, %arg12: memref<1x128xf32, #tpu.memory_space<vmem>>, %arg13: memref<128x128xbf16, #tpu.memory_space<vmem>>, %arg14: memref<1x128xf32, #tpu.memory_space<vmem>>, %arg15: memref<8x128xf32, #tpu.memory_space<vmem>>, %arg16: memref<8x128xf32, #tpu.memory_space<vmem>>, %arg17: memref<8x128xf32, #tpu.memory_space<vmem>>) attributes {dimension_semantics = [#tpu.dimension_semantics<parallel>], iteration_bounds = array<i64: 1>, scalar_prefetch = 0 : i64, scratch_operands = 1 : i64, tpu.core_type = #tpu.core_type<tc>, window_params = [{transform_indices = @transform_0, window_bounds = array<i64: 8, 16>}, {pipeline_mode = #tpu.pipeline_mode<synchronous>, transform_indices = @transform_1, window_bounds = array<i64: 16, 128>}, {pipeline_mode = #tpu.pipeline_mode<synchronous>, transform_indices = @transform_2, window_bounds = array<i64: 1, 128>}, {pipeline_mode = #tpu.pipeline_mode<synchronous>, transform_indices = @transform_3, window_bounds = array<i64: 128, 128>}, {pipeline_mode = #tpu.pipeline_mode<synchronous>, transform_indices = @transform_4, window_bounds = array<i64: 1, 128>}, {pipeline_mode = #tpu.pipeline_mode<synchronous>, transform_indices = @transform_5, window_bounds = array<i64: 128, 128>}, {pipeline_mode = #tpu.pipeline_mode<synchronous>, transform_indices = @transform_6, window_bounds = array<i64: 1, 128>}, {transform_indices = @transform_7, window_bounds = array<i64: 8, 8>}, {pipeline_mode = #tpu.pipeline_mode<synchronous>, transform_indices = @transform_8, window_bounds = array<i64: 128, 128>}, {pipeline_mode = #tpu.pipeline_mode<synchronous>, transform_indices = @transform_9, window_bounds = array<i64: 1, 128>}, {pipeline_mode = #tpu.pipeline_mode<synchronous>, transform_indices = @transform_10, window_bounds = array<i64: 128, 128>}, {pipeline_mode = #tpu.pipeline_mode<synchronous>, transform_indices = @transform_11, window_bounds = array<i64: 1, 128>}, {pipeline_mode = #tpu.pipeline_mode<synchronous>, transform_indices = @transform_12, window_bounds = array<i64: 128, 128>}, {pipeline_mode = #tpu.pipeline_mode<synchronous>, transform_indices = @transform_13, window_bounds = array<i64: 1, 128>}, {transform_indices = @transform_14, window_bounds = array<i64: 8, 128>}, {transform_indices = @transform_15, window_bounds = array<i64: 8, 128>}]} {
    %c0 = arith.constant 0 : index
    %c0_0 = arith.constant 0 : index
    %0 = vector.load %arg1[%c0, %c0_0] : memref<8x16xf32, #tpu.memory_space<vmem>>, vector<8x16xf32>
    %1 = arith.truncf %0 : vector<8x16xf32> to vector<8x16xbf16>
    %c0_1 = arith.constant 0 : index
    %c0_2 = arith.constant 0 : index
    %2 = vector.load %arg2[%c0_1, %c0_2] : memref<16x128xbf16, #tpu.memory_space<vmem>>, vector<16x128xbf16>
    %cst = arith.constant dense<0.000000e+00> : vector<8x128xf32>
    %3 = tpu.matmul %1, %2, %cst {dimension_numbers = #tpu.dot_dimension_numbers<[1], [0], [0], [1], [0, 0, 1, 1], [], []>} : vector<8x16xbf16>, vector<16x128xbf16>, vector<8x128xf32> -> vector<8x128xf32>
    %c0_3 = arith.constant 0 : index
    %c0_4 = arith.constant 0 : index
    %4 = vector.load %arg3[%c0_3, %c0_4] : memref<1x128xf32, #tpu.memory_space<vmem>>, vector<1x128xf32>
    %5 = vector.broadcast %4 : vector<1x128xf32> to vector<8x128xf32>
    %6 = arith.addf %3, %5 : vector<8x128xf32>
    %cst_5 = arith.constant 0.000000e+00 : f32
    %7 = vector.broadcast %cst_5 : f32 to vector<8x128xf32>
    %8 = arith.maximumf %6, %7 : vector<8x128xf32>
    %9 = arith.truncf %8 : vector<8x128xf32> to vector<8x128xbf16>
    %c0_6 = arith.constant 0 : index
    %c0_7 = arith.constant 0 : index
    %10 = vector.load %arg4[%c0_6, %c0_7] : memref<128x128xbf16, #tpu.memory_space<vmem>>, vector<128x128xbf16>
    %cst_8 = arith.constant dense<0.000000e+00> : vector<8x128xf32>
    %11 = tpu.matmul %9, %10, %cst_8 {dimension_numbers = #tpu.dot_dimension_numbers<[1], [0], [0], [1], [0, 0, 1, 1], [], []>} : vector<8x128xbf16>, vector<128x128xbf16>, vector<8x128xf32> -> vector<8x128xf32>
    %c0_9 = arith.constant 0 : index
    %c0_10 = arith.constant 0 : index
    %12 = vector.load %arg5[%c0_9, %c0_10] : memref<1x128xf32, #tpu.memory_space<vmem>>, vector<1x128xf32>
    %13 = vector.broadcast %12 : vector<1x128xf32> to vector<8x128xf32>
    %14 = arith.addf %11, %13 : vector<8x128xf32>
    %cst_11 = arith.constant 0.000000e+00 : f32
    %15 = vector.broadcast %cst_11 : f32 to vector<8x128xf32>
    %16 = arith.maximumf %14, %15 : vector<8x128xf32>
    %17 = arith.truncf %16 : vector<8x128xf32> to vector<8x128xbf16>
    %c0_12 = arith.constant 0 : index
    %c0_13 = arith.constant 0 : index
    %18 = vector.load %arg6[%c0_12, %c0_13] : memref<128x128xbf16, #tpu.memory_space<vmem>>, vector<128x128xbf16>
    %cst_14 = arith.constant dense<0.000000e+00> : vector<8x128xf32>
    %19 = tpu.matmul %17, %18, %cst_14 {dimension_numbers = #tpu.dot_dimension_numbers<[1], [0], [0], [1], [0, 0, 1, 1], [], []>} : vector<8x128xbf16>, vector<128x128xbf16>, vector<8x128xf32> -> vector<8x128xf32>
    %c0_15 = arith.constant 0 : index
    %c0_16 = arith.constant 0 : index
    %20 = vector.load %arg7[%c0_15, %c0_16] : memref<1x128xf32, #tpu.memory_space<vmem>>, vector<1x128xf32>
    %21 = vector.broadcast %20 : vector<1x128xf32> to vector<8x128xf32>
    %22 = arith.addf %19, %21 : vector<8x128xf32>
    %c64_i32 = arith.constant 64 : i32
    %23 = tpu.dynamic_rotate %22 by %c64_i32 dim 1 : vector<8x128xf32>, i32 -> vector<8x128xf32>
    %cst_17 = arith.constant 0.000000e+00 : f32
    %24 = vector.broadcast %cst_17 : f32 to vector<8x128xf32>
    %c0_18 = arith.constant 0 : index
    %c0_19 = arith.constant 0 : index
    %25 = vector.load %arg17[%c0_18, %c0_19] : memref<8x128xf32, #tpu.memory_space<vmem>>, vector<8x128xf32>
    tpu.vector_store %arg17[%c0_18, %c0_19], %24 {strides = array<i32>} : memref<8x128xf32, #tpu.memory_space<vmem>>, vector<8x128xf32>,
    %c0_20 = arith.constant 0 : index
    %c0_21 = arith.constant 0 : index
    %26 = vector.load %arg8[%c0_20, %c0_21] : memref<8x8xf32, #tpu.memory_space<vmem>>, vector<8x8xf32>
    %c0_22 = arith.constant 0 : index
    %c0_23 = arith.constant 0 : index
    %27 = vector.load %arg17[%c0_22, %c0_23] : memref<8x128xf32, #tpu.memory_space<vmem>>, vector<8x8xf32>
    tpu.vector_store %arg17[%c0_22, %c0_23], %26 {strides = array<i32>} : memref<8x128xf32, #tpu.memory_space<vmem>>, vector<8x8xf32>,
    %c0_24 = arith.constant 0 : index
    %c0_25 = arith.constant 0 : index
    %28 = vector.load %arg17[%c0_24, %c0_25] : memref<8x128xf32, #tpu.memory_space<vmem>>, vector<8x128xf32>
    %cst_26 = arith.constant 5.000000e-01 : f32
    %29 = vector.broadcast %cst_26 : f32 to vector<8x128xf32>
    %30 = arith.mulf %29, %23 : vector<8x128xf32>
    %31 = math.exp %30 : vector<8x128xf32>
    %32 = arith.mulf %28, %31 : vector<8x128xf32>
    %33 = arith.addf %22, %32 : vector<8x128xf32>
    %34 = arith.truncf %33 : vector<8x128xf32> to vector<8x128xbf16>
    %c0_27 = arith.constant 0 : index
    %c0_28 = arith.constant 0 : index
    %35 = vector.load %arg9[%c0_27, %c0_28] : memref<128x128xbf16, #tpu.memory_space<vmem>>, vector<128x128xbf16>
    %cst_29 = arith.constant dense<0.000000e+00> : vector<8x128xf32>
    %36 = tpu.matmul %34, %35, %cst_29 {dimension_numbers = #tpu.dot_dimension_numbers<[1], [0], [0], [1], [0, 0, 1, 1], [], []>} : vector<8x128xbf16>, vector<128x128xbf16>, vector<8x128xf32> -> vector<8x128xf32>
    %c0_30 = arith.constant 0 : index
    %c0_31 = arith.constant 0 : index
    %37 = vector.load %arg10[%c0_30, %c0_31] : memref<1x128xf32, #tpu.memory_space<vmem>>, vector<1x128xf32>
    %38 = vector.broadcast %37 : vector<1x128xf32> to vector<8x128xf32>
    %39 = arith.addf %36, %38 : vector<8x128xf32>
    %cst_32 = arith.constant 0.000000e+00 : f32
    %40 = vector.broadcast %cst_32 : f32 to vector<8x128xf32>
    %41 = arith.maximumf %39, %40 : vector<8x128xf32>
    %42 = arith.truncf %41 : vector<8x128xf32> to vector<8x128xbf16>
    %c0_33 = arith.constant 0 : index
    %c0_34 = arith.constant 0 : index
    %43 = vector.load %arg11[%c0_33, %c0_34] : memref<128x128xbf16, #tpu.memory_space<vmem>>, vector<128x128xbf16>
    %cst_35 = arith.constant dense<0.000000e+00> : vector<8x128xf32>
    %44 = tpu.matmul %42, %43, %cst_35 {dimension_numbers = #tpu.dot_dimension_numbers<[1], [0], [0], [1], [0, 0, 1, 1], [], []>} : vector<8x128xbf16>, vector<128x128xbf16>, vector<8x128xf32> -> vector<8x128xf32>
    %c0_36 = arith.constant 0 : index
    %c0_37 = arith.constant 0 : index
    %45 = vector.load %arg12[%c0_36, %c0_37] : memref<1x128xf32, #tpu.memory_space<vmem>>, vector<1x128xf32>
    %46 = vector.broadcast %45 : vector<1x128xf32> to vector<8x128xf32>
    %47 = arith.addf %44, %46 : vector<8x128xf32>
    %cst_38 = arith.constant 0.000000e+00 : f32
    %48 = vector.broadcast %cst_38 : f32 to vector<8x128xf32>
    %49 = arith.maximumf %47, %48 : vector<8x128xf32>
    %50 = arith.truncf %49 : vector<8x128xf32> to vector<8x128xbf16>
    %c0_39 = arith.constant 0 : index
    %c0_40 = arith.constant 0 : index
    %51 = vector.load %arg13[%c0_39, %c0_40] : memref<128x128xbf16, #tpu.memory_space<vmem>>, vector<128x128xbf16>
    %cst_41 = arith.constant dense<0.000000e+00> : vector<8x128xf32>
    %52 = tpu.matmul %50, %51, %cst_41 {dimension_numbers = #tpu.dot_dimension_numbers<[1], [0], [0], [1], [0, 0, 1, 1], [], []>} : vector<8x128xbf16>, vector<128x128xbf16>, vector<8x128xf32> -> vector<8x128xf32>
    %c0_42 = arith.constant 0 : index
    %c0_43 = arith.constant 0 : index
    %53 = vector.load %arg14[%c0_42, %c0_43] : memref<1x128xf32, #tpu.memory_space<vmem>>, vector<1x128xf32>
    %54 = vector.broadcast %53 : vector<1x128xf32> to vector<8x128xf32>
    %55 = arith.addf %52, %54 : vector<8x128xf32>
    %c0_44 = arith.constant 0 : index
    %c0_45 = arith.constant 0 : index
    %56 = vector.load %arg15[%c0_44, %c0_45] : memref<8x128xf32, #tpu.memory_space<vmem>>, vector<8x128xf32>
    tpu.vector_store %arg15[%c0_44, %c0_45], %55 {strides = array<i32>} : memref<8x128xf32, #tpu.memory_space<vmem>>, vector<8x128xf32>,
    %c0_46 = arith.constant 0 : index
    %c0_47 = arith.constant 0 : index
    %57 = vector.load %arg16[%c0_46, %c0_47] : memref<8x128xf32, #tpu.memory_space<vmem>>, vector<8x128xf32>
    tpu.vector_store %arg16[%c0_46, %c0_47], %22 {strides = array<i32>} : memref<8x128xf32, #tpu.memory_space<vmem>>, vector<8x128xf32>,
    return
  }
  func.func @transform_0(%arg0: i32) -> (i32, i32) {
    %c0_i32 = arith.constant 0 : i32
    %c0_i32_0 = arith.constant 0 : i32
    return %arg0, %c0_i32 : i32, i32
  }
  func.func @transform_1(%arg0: i32) -> (i32, i32) {
    %c0_i32 = arith.constant 0 : i32
    %c0_i32_0 = arith.constant 0 : i32
    %c0_i32_1 = arith.constant 0 : i32
    return %c0_i32, %c0_i32_0 : i32, i32
  }
  func.func @transform_2(%arg0: i32) -> (i32, i32) {
    %c0_i32 = arith.constant 0 : i32
    %c0_i32_0 = arith.constant 0 : i32
    %c0_i32_1 = arith.constant 0 : i32
    return %c0_i32, %c0_i32_0 : i32, i32
  }
  func.func @transform_3(%arg0: i32) -> (i32, i32) {
    %c0_i32 = arith.constant 0 : i32
    %c0_i32_0 = arith.constant 0 : i32
    %c0_i32_1 = arith.constant 0 : i32
    return %c0_i32, %c0_i32_0 : i32, i32
  }
  func.func @transform_4(%arg0: i32) -> (i32, i32) {
    %c0_i32 = arith.constant 0 : i32
    %c0_i32_0 = arith.constant 0 : i32
    %c0_i32_1 = arith.constant 0 : i32
    return %c0_i32, %c0_i32_0 : i32, i32
  }
  func.func @transform_5(%arg0: i32) -> (i32, i32) {
    %c0_i32 = arith.constant 0 : i32
    %c0_i32_0 = arith.constant 0 : i32
    %c0_i32_1 = arith.constant 0 : i32
    return %c0_i32, %c0_i32_0 : i32, i32
  }
  func.func @transform_6(%arg0: i32) -> (i32, i32) {
    %c0_i32 = arith.constant 0 : i32
    %c0_i32_0 = arith.constant 0 : i32
    %c0_i32_1 = arith.constant 0 : i32
    return %c0_i32, %c0_i32_0 : i32, i32
  }
  func.func @transform_7(%arg0: i32) -> (i32, i32) {
    %c0_i32 = arith.constant 0 : i32
    %c0_i32_0 = arith.constant 0 : i32
    return %arg0, %c0_i32 : i32, i32
  }
  func.func @transform_8(%arg0: i32) -> (i32, i32) {
    %c0_i32 = arith.constant 0 : i32
    %c0_i32_0 = arith.constant 0 : i32
    %c0_i32_1 = arith.constant 0 : i32
    return %c0_i32, %c0_i32_0 : i32, i32
  }
  func.func @transform_9(%arg0: i32) -> (i32, i32) {
    %c0_i32 = arith.constant 0 : i32
    %c0_i32_0 = arith.constant 0 : i32
    %c0_i32_1 = arith.constant 0 : i32
    return %c0_i32, %c0_i32_0 : i32, i32
  }
  func.func @transform_10(%arg0: i32) -> (i32, i32) {
    %c0_i32 = arith.constant 0 : i32
    %c0_i32_0 = arith.constant 0 : i32
    %c0_i32_1 = arith.constant 0 : i32
    return %c0_i32, %c0_i32_0 : i32, i32
  }
  func.func @transform_11(%arg0: i32) -> (i32, i32) {
    %c0_i32 = arith.constant 0 : i32
    %c0_i32_0 = arith.constant 0 : i32
    %c0_i32_1 = arith.constant 0 : i32
    return %c0_i32, %c0_i32_0 : i32, i32
  }
  func.func @transform_12(%arg0: i32) -> (i32, i32) {
    %c0_i32 = arith.constant 0 : i32
    %c0_i32_0 = arith.constant 0 : i32
    %c0_i32_1 = arith.constant 0 : i32
    return %c0_i32, %c0_i32_0 : i32, i32
  }
  func.func @transform_13(%arg0: i32) -> (i32, i32) {
    %c0_i32 = arith.constant 0 : i32
    %c0_i32_0 = arith.constant 0 : i32
    %c0_i32_1 = arith.constant 0 : i32
    return %c0_i32, %c0_i32_0 : i32, i32
  }
  func.func @transform_14(%arg0: i32) -> (i32, i32) {
    %c0_i32 = arith.constant 0 : i32
    %c0_i32_0 = arith.constant 0 : i32
    return %arg0, %c0_i32 : i32, i32
  }
  func.func @transform_15(%arg0: i32) -> (i32, i32) {
    %c0_i32 = arith.constant 0 : i32
    %c0_i32_0 = arith.constant 0 : i32
    return %arg0, %c0_i32 : i32, i32
  }
}

</mosaic_0001>

<bundles_post_ra>
// kernel: vae_forward.1
= control target key start
LH: loop header
LB: loop body
LE: loop exit
PB: predicated region body
PF: predicated region fallthrough
CT: control target
= control target key end

     0   :  { %21 = vsyncpa [#allocation4], 0  ;;  %s1351_s0 = inlined_call_operand.vmem [shape: f32[8,16], index: 0, kind: input, shape index: {}]   ;;  %s1352_s1 = inlined_call_operand.hbm [shape: bf16[16,128], index: 1, kind: input, shape index: {}]   ;;  %s1353_s2 = inlined_call_operand.vmem [shape: f32[1,128], index: 2, kind: input, shape index: {}]   ;;  %s1354_s3 = inlined_call_operand.hbm [shape: bf16[128,128], index: 3, kind: input, shape index: {}]   ;;  %s1355_s4 = inlined_call_operand.vmem [shape: f32[1,128], index: 4, kind: input, shape index: {}]   ;;  %s1356_s5 = inlined_call_operand.hbm [shape: bf16[128,128], index: 5, kind: input, shape index: {}]   ;;  %s1357_s6 = inlined_call_operand.hbm [shape: f32[1,128], index: 6, kind: input, shape index: {}]   ;;  %s1358_s7 = inlined_call_operand.hbm [shape: f32[8,8], index: 7, kind: input, shape index: {}]   ;;  %s1359_s8 = inlined_call_operand.hbm [shape: bf16[128,128], index: 8, kind: input, shape index: {}]   ;;  %s1360_s9 = inlined_call_operand.hbm [shape: f32[1,128], index: 9, kind: input, shape index: {}]   ;;  %s1361_s10 = inlined_call_operand.hbm [shape: bf16[128,128], index: 10, kind: input, shape index: {}]   ;;  %s1362_s11 = inlined_call_operand.vmem [shape: f32[1,128], index: 11, kind: input, shape index: {}]   ;;  %s1363_s12 = inlined_call_operand.hbm [shape: bf16[128,128], index: 12, kind: input, shape index: {}]   ;;  %s1364_s13 = inlined_call_operand.hbm [shape: f32[1,128], index: 13, kind: input, shape index: {}]   ;;  %s1365_s14 = inlined_call_operand.hbm [shape: f32[8,128], index: 14, kind: output, shape index: {0}]   ;;  %s1366_s15 = inlined_call_operand.vmem [shape: f32[8,128], index: 15, kind: output, shape index: {1}]  }
   0x1   :  { %22 = vsyncpa [#allocation7], 0 }
   0x2   :  { %23 = vsyncpa [#allocation10], 0 }
   0x3   :  { %24 = vsyncpa [#allocation13], 0 }
   0x4   :  { %25 = vsyncpa [#allocation16], 0 }
   0x5   :  { %26 = vsyncpa [#allocation19], 0 }
   0x6   :  { %27 = vsyncpa [#allocation5], 0  ;;  %s49_s20 = sshll.u32 %s1354_s3, 4  ;;  %s1190_s21 = smov [#allocation6]   ;;  %s50_s20 = int_to_ptr.hbm [resolvable:$true] %s49_s20 }
   0x7   :  { %s51_s22 = sshll.u32 %s1190_s21, 4  ;;  %s78_s25 = sshll.u32 %s1357_s6, 4  ;;  %s52_s22 = int_to_ptr.vmem [resolvable:$true] %s51_s22  ;;  %s79_s25 = int_to_ptr.hbm [resolvable:$true] %s78_s25 }
   0x8   :  { %s1191_s26 = smov 64   ;;  %s1192_s27 = smov 4  }
   0x9   :  { %57 = dma.hbm_to_vmem [thread:$0]  %s50_s20, 1024, %s52_s22, [#allocation7], %s1191_s26, %s1191_s26, %s1192_s27  }
   0xa   :  { %s1193_s28 = smov [#allocation9]   ;;  %s99_s3 = sshll.u32 %s1359_s8, 4  ;;  %s100_s3 = int_to_ptr.hbm [resolvable:$true] %s99_s3 }
   0xb   :  { %s80_s29 = sshll.u32 %s1193_s28, 4  ;;  %s123_s6 = sshll.u32 %s1361_s10, 4  ;;  %s81_s29 = int_to_ptr.vmem [resolvable:$true] %s80_s29  ;;  %s124_s6 = int_to_ptr.hbm [resolvable:$true] %s123_s6 }
   0xc   :  { %83 = dma.hbm_to_vmem [thread:$0]  %s79_s25, 16, %s81_s29, [#allocation10]  }
   0xd   :  { %s1194_s19 = smov [#allocation12]   ;;  %s1195_s20 = smov [#allocation15]  }
   0xe   :  { %s101_s21 = sshll.u32 %s1194_s19, 4  ;;  %s125_s22 = sshll.u32 %s1195_s20, 4  ;;  %s102_s21 = int_to_ptr.vmem [resolvable:$true] %s101_s21  ;;  %s126_s22 = int_to_ptr.vmem [resolvable:$true] %s125_s22 }
   0xf   :  { %107 = dma.hbm_to_vmem [thread:$0]  %s100_s3, 1024, %s102_s21, [#allocation13], %s1191_s26, %s1191_s26, %s1192_s27  }
  0x10   :  { %s34_s8 = sshll.u32 %s1352_s1, 4  ;;  %s64_s28 = sshll.u32 %s1356_s5, 4  ;;  %s35_s8 = int_to_ptr.hbm [resolvable:$true] %s34_s8  ;;  %s65_s28 = int_to_ptr.hbm [resolvable:$true] %s64_s28 }
  0x11   :  { %131 = dma.hbm_to_vmem [thread:$0]  %s124_s6, 1024, %s126_s22, [#allocation16], %s1191_s26, %s1191_s26, %s1192_s27  }
  0x12   :  { %s1196_s29 = smov [#allocation3]   ;;  %s1197_s16 = smov [#allocation8]  }
  0x13   :  { %s36_s30 = sshll.u32 %s1196_s29, 4  ;;  %s66_s1 = sshll.u32 %s1197_s16, 4  ;;  %s37_s30 = int_to_ptr.vmem [resolvable:$true] %s36_s30  ;;  %s67_s1 = int_to_ptr.vmem [resolvable:$true] %s66_s1 }
  0x14   :  { %42 = dma.hbm_to_vmem [thread:$0]  %s35_s8, 128, %s37_s30, [#allocation4], %s1191_s26, %s1191_s26, %s1192_s27  }
  0x15   :  { %s89_s18 = sshll.u32 %s1358_s7, 4  ;;  %s113_s19 = sshll.u32 %s1360_s9, 4  ;;  %s90_s18 = int_to_ptr.hbm [resolvable:$true] %s89_s18  ;;  %s114_s19 = int_to_ptr.hbm [resolvable:$true] %s113_s19 }
  0x16   :  { %72 = dma.hbm_to_vmem [thread:$0]  %s65_s28, 1024, %s67_s1, [#allocation7], %s1191_s26, %s1191_s26, %s1192_s27  }
  0x17   :  { %s1198_s21 = smov [#allocation11]   ;;  %s1199_s22 = smov [#allocation14]  }
  0x18   :  { %s91_s20 = sshll.u32 %s1198_s21, 4  ;;  %s115_s23 = sshll.u32 %s1199_s22, 4  ;;  %s92_s20 = int_to_ptr.vmem [resolvable:$true] %s91_s20  ;;  %s116_s23 = int_to_ptr.vmem [resolvable:$true] %s115_s23 }
  0x19   :  { %94 = dma.hbm_to_vmem [thread:$0]  %s90_s18, 128, %s92_s20, [#allocation10]  }
  0x1a   :  { %s138_s7 = sshll.u32 %s1363_s12, 4  ;;  %s152_s28 = sshll.u32 %s1364_s13, 4  ;;  %s139_s7 = int_to_ptr.hbm [resolvable:$true] %s138_s7  ;;  %s153_s28 = int_to_ptr.hbm [resolvable:$true] %s152_s28 }
  0x1b   :  { %118 = dma.hbm_to_vmem [thread:$0]  %s114_s19, 16, %s116_s23, [#allocation13]  }
  0x1c   :  { %s1200_s29 = smov [#allocation17]   ;;  %s1201_s30 = smov [#allocation18]  }
  0x1d   :  { %s140_s9 = sshll.u32 %s1200_s29, 4  ;;  %s154_s16 = sshll.u32 %s1201_s30, 4  ;;  %s141_s9 = int_to_ptr.vmem [resolvable:$true] %s140_s9  ;;  %s155_s16 = int_to_ptr.vmem [resolvable:$true] %s154_s16 }
  0x1e   :  { %146 = dma.hbm_to_vmem [thread:$0]  %s139_s7, 1024, %s141_s9, [#allocation16], %s1191_s26, %s1191_s26, %s1192_s27  }
  0x1f   :  { %157 = dma.hbm_to_vmem [thread:$0]  %s153_s28, 16, %s155_s16, [#allocation19]  }
  0x20   :  { %1176 = dma.done.wait [#allocation4], 128  }
  0x21   :  { %1177 = vsyncadd [#allocation4], 4294967168 }
  0x22   :  { %1178 = dma.done.wait [#allocation7], 2048  }
  0x23   :  { %1179 = vsyncadd [#allocation7], 4294965248 }
  0x24   :  { %1180 = dma.done.wait [#allocation10], 144  }
  0x25   :  { %1181 = vsyncadd [#allocation10], 4294967152 }
  0x26   :  { %1182 = dma.done.wait [#allocation13], 1040  }
  0x27   :  { %1183 = vsyncadd [#allocation13], 4294966256 }
  0x28   :  { %1184 = dma.done.wait [#allocation16], 2048  }
  0x29   :  { %1185 = vsyncadd [#allocation16], 4294965248 }
  0x2a   :  { %1186 = dma.done.wait [#allocation19], 16  }
  0x2b   :  { %1187 = vsyncadd [#allocation19], 4294967280  ;;  %v849_v0 = vld [vmem:[#allocation3] sm:$0xff]  ;;  %v199_v1 = vld [vmem:[%s1351_s0] sm:$0xff]  ;;  %vm213_vm0 = vcmask 130048   ;;  %v1202_v40 = vmov 0.0  }
  0x2c   :  { %v857_v2 = vld [vmem:[#allocation6 + $0x38] sm:$0xff]  ;;  %v200_v3 = vpack.c.bf16 %v199_v1, %v199_v1  ;;  %224 = vmatpush.bf16.msra.mxu0 %v849_v0  ;;  %v856_v4 = vld [vmem:[#allocation6 + $0x30] sm:$0xff]  ;;  %v855_v5 = vld [vmem:[#allocation6 + $0x28] sm:$0xff]  ;;  %398 = vst [vmem:[#allocation2] sm:$0xff] %v1202_v40  ;;  %vm400_vm1 = vcmask 64512   ;;  %s665_s19 = sshll.u32 %s1365_s14, 4  ;;  %s666_s19 = int_to_ptr.hbm [resolvable:$true] %s665_s19 }
  0x2d   :  { %300 = vmatpush.bf16.msra.mxu1 %v857_v2  ;;  %v854_v6 = vld [vmem:[#allocation6 + $0x20] sm:$0xff]  ;;  %v853_v7 = vld [vmem:[#allocation6 + $0x18] sm:$0xff]  ;;  %v852_v8 = vld [vmem:[#allocation6 + $0x10] sm:$0xff] }
  0x2e   :  { %v851_v9 = vld [vmem:[#allocation6 + $0x8] sm:$0xff]  ;;  %v850_v10 = vld [vmem:[#allocation6] sm:$0xff]  ;;  %v865_v11 = vld [vmem:[#allocation8 + $0x38] sm:$0xff] }
  0x2f   :  { %688 = vmatmul.msk.bf16.vlgmr.msra.gmra.mxu0 %vm213_vm0, %v200_v3  ;;  %383 = vmatpush.bf16.msra.mxu2 %v865_v11  ;;  %v864_v12 = vld [vmem:[#allocation8 + $0x30] sm:$0xff]  ;;  %v863_v13 = vld [vmem:[#allocation8 + $0x28] sm:$0xff]  ;;  %v862_v14 = vld [vmem:[#allocation8 + $0x20] sm:$0xff] }
  0x30   :  { %v861_v15 = vld [vmem:[#allocation8 + $0x18] sm:$0xff]  ;;  %v860_v16 = vld [vmem:[#allocation8 + $0x10] sm:$0xff]  ;;  %v859_v23 = vld [vmem:[#allocation8 + $0x8] sm:$0xff] }
  0x31   :  { %301 = vmatpush.bf16.msra.mxu1 %v856_v4  ;;  %v904_v17 = vld [vmem:[%s1353_s2] ss:$0 sm:$0xff]  ;;  %v858_v24 = vld [vmem:[#allocation8] sm:$0xff]  ;;  %v871_v33 = vld [vmem:[#allocation12 + $0x28] sm:$0xff] }
  0x32   :  { %v905_v25 = vld [vmem:[%s1355_s4] ss:$0 sm:$0xff]  ;;  %v873_v31 = vld [vmem:[#allocation12 + $0x38] sm:$0xff]  ;;  %v872_v32 = vld [vmem:[#allocation12 + $0x30] sm:$0xff] }
  0x33   :  { %384 = vmatpush.bf16.msra.mxu2 %v864_v12  ;;  %477 = vmatpush.bf16.msra.mxu3 %v873_v31  ;;  %v870_v34 = vld [vmem:[#allocation12 + $0x20] sm:$0xff]  ;;  %v906_v35 = vld [vmem:[#allocation9] ss:$0 sm:$0xff]  ;;  %v869_v39 = vld [vmem:[#allocation12 + $0x18] sm:$0xff] }
  0x34   :  { %v399_v41 = vld [vmem:[#allocation11] sm:$0xff]  ;;  %v868_v42 = vld [vmem:[#allocation12 + $0x10] sm:$0xff]  ;;  %v867_v43 = vld [vmem:[#allocation12 + $0x8] sm:$0xff] }
  0x35   :  { %302 = vmatpush.bf16.msra.mxu1 %v855_v5  ;;  %401 = vst.msk [vmem:[#allocation2] sm:$0xff] %vm400_vm1, %v399_v41  ;;  %v866_v44 = vld [vmem:[#allocation12] sm:$0xff]  ;;  %v880_v46 = vld [vmem:[#allocation15 + $0x30] sm:$0xff]  ;;  %v879_v47 = vld [vmem:[#allocation15 + $0x28] sm:$0xff] }
  0x36   :  { %v881_v45 = vld [vmem:[#allocation15 + $0x38] sm:$0xff]  ;;  %v878_v48 = vld [vmem:[#allocation15 + $0x20] sm:$0xff]  ;;  %v876_v53 = vld [vmem:[#allocation15 + $0x10] sm:$0xff] }
  0x37   :  { %385 = vmatpush.bf16.msra.mxu2 %v863_v13  ;;  %478 = vmatpush.bf16.msra.mxu3 %v872_v32  ;;  %v877_v50 = vld [vmem:[#allocation15 + $0x18] sm:$0xff]  ;;  %v875_v59 = vld [vmem:[#allocation15 + $0x8] sm:$0xff]  ;;  %v874_v60 = vld [vmem:[#allocation15] sm:$0xff] }
  0x38   :  { %560 = vmatpush.bf16.msrb.mxu0 %v881_v45  ;;  %v889_v61 = vld [vmem:[#allocation17 + $0x38] sm:$0xff]  ;;  %v888_v62 = vld [vmem:[#allocation17 + $0x30] sm:$0xff]  ;;  %v887_v63 = vld [vmem:[#allocation17 + $0x28] sm:$0xff] }
  0x39   :  { %303 = vmatpush.bf16.msra.mxu1 %v854_v6  ;;  %v886_v0 = vld [vmem:[#allocation17 + $0x20] sm:$0xff]  ;;  %v885_v1 = vld [vmem:[#allocation17 + $0x18] sm:$0xff]  ;;  %v884_v2 = vld [vmem:[#allocation17 + $0x10] sm:$0xff] }
  0x3a   :  { %v907_v3 = vld [vmem:[#allocation14] ss:$0 sm:$0xff]  ;;  %v908_v11 = vld [vmem:[%s1362_s11] ss:$0 sm:$0xff] }
  0x3b   :  { %386 = vmatpush.bf16.msra.mxu2 %v862_v14  ;;  %479 = vmatpush.bf16.msra.mxu3 %v871_v33 }
  0x3c   :  { %561 = vmatpush.bf16.msrb.mxu0 %v880_v46  ;;  %v402_v54 = vld [vmem:[#allocation2] sm:$0xff] }
  0x3d   :  { %304 = vmatpush.bf16.msra.mxu1 %v853_v7 }
  0x3f   :  { %387 = vmatpush.bf16.msra.mxu2 %v861_v15  ;;  %480 = vmatpush.bf16.msra.mxu3 %v870_v34 }
  0x40   :  { %562 = vmatpush.bf16.msrb.mxu0 %v879_v47 }
  0x41   :  { %305 = vmatpush.bf16.msra.mxu1 %v852_v8 }
  0x43   :  { %388 = vmatpush.bf16.msra.mxu2 %v860_v16  ;;  %481 = vmatpush.bf16.msra.mxu3 %v869_v39 }
  0x44   :  { %563 = vmatpush.bf16.msrb.mxu0 %v878_v48 }
  0x45   :  { %306 = vmatpush.bf16.msra.mxu1 %v851_v9  ;;  %v883_v9 = vld [vmem:[#allocation17 + $0x8] sm:$0xff] }
  0x47   :  { %389 = vmatpush.bf16.msra.mxu2 %v859_v23  ;;  %482 = vmatpush.bf16.msra.mxu3 %v868_v42 }
  0x48   :  { %564 = vmatpush.bf16.msrb.mxu0 %v877_v50 }
  0x49   :  { %307 = vmatpush.bf16.msra.mxu1 %v850_v10  ;;  %v882_v10 = vld [vmem:[#allocation17] sm:$0xff] }
  0x4b   :  { %390 = vmatpush.bf16.msra.mxu2 %v858_v24  ;;  %483 = vmatpush.bf16.msra.mxu3 %v867_v43 }
  0x4c   :  { %565 = vmatpush.bf16.msrb.mxu0 %v876_v53 }
  0x4d   :  { %643 = vmatpush.bf16.msrb.mxu1 %v889_v61 }
  0x4f   :  { %484 = vmatpush.bf16.msra.mxu3 %v866_v44 }
  0x50   :  { %566 = vmatpush.bf16.msrb.mxu0 %v875_v59 }
  0x51   :  { %644 = vmatpush.bf16.msrb.mxu1 %v888_v62 }
  0x54   :  { %567 = vmatpush.bf16.msrb.mxu0 %v874_v60 }
  0x55   :  { %645 = vmatpush.bf16.msrb.mxu1 %v887_v63 }
  0x59   :  { %646 = vmatpush.bf16.msrb.mxu1 %v886_v0 }
  0x5d   :  { %647 = vmatpush.bf16.msrb.mxu1 %v885_v1 }
  0x61   :  { %648 = vmatpush.bf16.msrb.mxu1 %v884_v2 }
  0x65   :  { %649 = vmatpush.bf16.msrb.mxu1 %v883_v9 }
  0x69   :  { %650 = vmatpush.bf16.msrb.mxu1 %v882_v10 }
  0xac   :  { %v226_v18 = vpop.f32.mrf.mxu0 }
  0xad   :  { %v227_v19 = vadd.f32 %v904_v17, %v226_v18  ;;  %v909_v17 = vld [vmem:[#allocation18] ss:$0 sm:$0xff] }
  0xaf   :  { %v230_v20 = vmax.f32 %v227_v19, 0.0 }
  0xb1   :  { %v231_v21 = vpack.c.bf16 %v230_v20, %v230_v20 }
  0xb3   :  { %308 = vmatmul.bf16.vlgmr.msra.gmra.mxu1 %v231_v21 }
  0xb4   :  { %v228_v22 = vpop.f32.mrf.mxu0 }
 0x130   :  { %v309_v26 = vpop.f32.mrf.mxu1 }
 0x131   :  { %v310_v27 = vadd.f32 %v905_v25, %v309_v26 }
 0x133   :  { %v313_v28 = vmax.f32 %v310_v27, 0.0 }
 0x135   :  { %v314_v29 = vpack.c.bf16 %v313_v28, %v313_v28 }
 0x137   :  { %391 = vmatmul.bf16.vlgmr.msra.gmra.mxu2 %v314_v29 }
 0x138   :  { %v311_v30 = vpop.f32.mrf.mxu1 }
 0x1ba   :  { %v392_v36 = vpop.f32.mrf.mxu2 }
 0x1bb   :  { %v393_v37 = vadd.f32 %v906_v35, %v392_v36 }
 0x1bd   :  { %657 = vst [vmem:[%s1366_s15] sm:$0xff] %v393_v37  ;;  %396 = vrot.lane.b32.xlu0 %v393_v37, %s1191_s26  ;;  %s1203_s26 = smov [#allocation20]  }
 0x1be   :  { %s663_s18 = sshll.u32 %s1203_s26, 4  ;;  %s664_s18 = int_to_ptr.vmem [resolvable:$true] %s663_s18 }
 0x1c2   :  { %v394_v38 = vpop.f32.mrf.mxu2 }
 0x22f   :  { %v397_v49 = vpop.permute.xlu0 %396 }
 0x230   :  { %v403_v51 = vmul.f32 0.5, %v397_v49 }
 0x232   :  { %v404_v52 = vmul.f32 1.442695, %v403_v51 }
 0x234   :  { %910 = vpow2.f32 %v404_v52 }
 0x23a   :  { %v911_v55 = vpop.eup %910 }
 0x23b   :  { %v406_v56 = vmul.f32 %v911_v55, %v402_v54 }
 0x23d   :  { %v407_v57 = vadd.f32 %v406_v56, %v393_v37 }
 0x23f   :  { %v408_v58 = vpack.c.bf16 %v407_v57, %v407_v57 }
 0x241   :  { %485 = vmatmul.bf16.vlgmr.msra.gmra.mxu3 %v408_v58 }
 0x2c4   :  { %v486_v4 = vpop.f32.mrf.mxu3 }
 0x2c5   :  { %v487_v5 = vadd.f32 %v907_v3, %v486_v4 }
 0x2c7   :  { %v490_v6 = vmax.f32 %v487_v5, 0.0 }
 0x2c9   :  { %v491_v7 = vpack.c.bf16 %v490_v6, %v490_v6 }
 0x2cb   :  { %568 = vmatmul.bf16.vlgmr.msrb.gmra.mxu0 %v491_v7 }
 0x2cc   :  { %v488_v8 = vpop.f32.mrf.mxu3 }
 0x348   :  { %v569_v12 = vpop.f32.mrf.mxu0 }
 0x349   :  { %v570_v13 = vadd.f32 %v908_v11, %v569_v12 }
 0x34b   :  { %v573_v14 = vmax.f32 %v570_v13, 0.0 }
 0x34d   :  { %v574_v15 = vpack.c.bf16 %v573_v14, %v573_v14 }
 0x34f   :  { %651 = vmatmul.bf16.vlgmr.msrb.gmra.mxu1 %v574_v15 }
 0x350   :  { %v571_v16 = vpop.f32.mrf.mxu0 }
 0x3cc   :  { %v652_v18 = vpop.f32.mrf.mxu1 }
 0x3cd   :  { %v653_v19 = vadd.f32 %v909_v17, %v652_v18 }
 0x3cf   :  { %656 = vst [vmem:[#allocation20] sm:$0xff] %v653_v19 }
 0x3d0   :  { %668 = dma.vmem_to_hbm [thread:$0]  %s664_s18, 128, %s666_s19, [#allocation5]  }
 0x3d4   :  { %v654_v20 = vpop.f32.mrf.mxu1 }
 0x3d5   :  { %1188 = dma.done.wait [#allocation5], 128  }
 0x3d6   :  { %1189 = vsyncadd [#allocation5], 4294967168 }
 0x3d7   :  { %677 = vsyncpa [#allocation4], 1 }
 0x3d8   :  { %678 = vsyncpa [#allocation7], 1 }
 0x3d9   :  { %679 = vsyncpa [#allocation10], 1 }
 0x3da   :  { %680 = vsyncpa [#allocation13], 1 }
 0x3db   :  { %681 = vsyncpa [#allocation16], 1 }
 0x3dc   :  { %682 = vsyncpa [#allocation19], 1 }
 0x3dd   :  { %683 = vsyncpa [#allocation5], 1 }

</bundles_post_ra>
